<compile_context>
chip_gen: v7x
topology: tpu7x:2x2x1
jax: 0.10.0
libtpu: 0.0.40
codegen_flags: <defaults>
</compile_context>

<pallas_src>
import functools

import jax
import jax.numpy as jnp
from jax.experimental import pallas as pl
from jax.experimental.pallas import tpu as pltpu

_LANE = 128
_SUBLANE = 8


def _round_up(x, m):
    return ((x + m - 1) // m) * m


def _bf16_transcendentals_ok():
    """True on chips with a bf16 EUP/VPU path (v6e / v7x); conservative False otherwise."""
    try:
        kind = jax.devices()[0].device_kind.lower()
    except Exception:
        return False
    return ("v6" in kind) or ("v7" in kind)


def _gaussian_smearing_kernel(coeff_ref, dist_ref, offset_ref, o_ref, *, bf16_exp):
    # coeff_ref:  (1,)     f32  SMEM  (scalar, not baked into the program)
    # dist_ref:   (TN, 1)  f32  VMEM  (rows on sublanes)
    # offset_ref: (1, G)   f32  VMEM  (gaussians on lanes; constant index_map -> resident)
    # o_ref:      (TN, G)  out_dtype
    coeff = coeff_ref[0]
    diff = dist_ref[...] - offset_ref[...]          # broadcast -> (TN, G) on the VPU
    x = coeff * diff * diff
    if bf16_exp:
        x = x.astype(jnp.bfloat16)                  # EUP bf16 exp path (v6e / v7x only)
    o_ref[...] = jnp.exp(x).astype(o_ref.dtype)


def gaussian_smearing(dist, offset, coeff, *, tile_n=8192, out_dtype=jnp.float32,
                      bf16_exp=None):
    """dist: any shape; returns (prod(dist.shape), num_gaussians) in out_dtype."""
    dist_flat = jnp.reshape(dist, (-1, 1)).astype(jnp.float32)     # (N, 1)
    offset2d = jnp.reshape(offset, (1, -1)).astype(jnp.float32)    # (1, G)
    coeff_arr = jnp.reshape(jnp.asarray(coeff, dtype=jnp.float32), (1,))
    n = dist_flat.shape[0]
    g = offset2d.shape[1]
    out_dtype = jnp.dtype(out_dtype)

    # ---- tile selection: all VMEM numbers include (8,128) tiling / lane padding ----
    dist_row_bytes = _LANE * 4                                   # (tile,1) f32 -> 128 lanes
    out_row_bytes = _round_up(g, _LANE) * out_dtype.itemsize     # (tile,G)  -> 128 lanes
    row_bytes = dist_row_bytes + out_row_bytes
    budget = 24 * 1024 * 1024                                    # double-buffered blocks; v7x-safe
    cap_rows = max(_SUBLANE, (budget // (2 * row_bytes)) // _SUBLANE * _SUBLANE)

    n_pad = _round_up(n, _SUBLANE)
    tile_n = max(_SUBLANE, _round_up(int(tile_n), _SUBLANE))
    tile_n = min(tile_n, cap_rows, n_pad)
    if n_pad > _SUBLANE:
        # >= 2 grid steps whenever possible so both v7x TensorCores get work.
        tile_n = min(tile_n, _round_up((n_pad + 1) // 2, _SUBLANE))
    grid_n = pl.cdiv(n, tile_n)   # partial last block handled by Pallas masking

    # Explicit scoped-VMEM limit: padded, double-buffered blocks + offset tile + margin.
    vmem_needed = 2 * tile_n * row_bytes + 2 * _SUBLANE * _LANE * 4 + 4096
    vmem_limit = int(min(max(vmem_needed + 6 * 2**20, 16 * 2**20), 48 * 2**20))

    if bf16_exp is None:
        bf16_exp = (out_dtype == jnp.bfloat16) and _bf16_transcendentals_ok()

    kernel = functools.partial(_gaussian_smearing_kernel, bf16_exp=bool(bf16_exp))

    out = pl.pallas_call(
        kernel,
        out_shape=jax.ShapeDtypeStruct((n, g), out_dtype),
        grid_spec=pltpu.PrefetchScalarGridSpec(
            num_scalar_prefetch=0,
            grid=(grid_n,),
            in_specs=[
                pl.BlockSpec(memory_space=pltpu.MemorySpace.SMEM),   # coeff scalar
                pl.BlockSpec((tile_n, 1), lambda i: (i, 0)),         # dist rows
                pl.BlockSpec((1, g), lambda i: (0, 0)),              # offset (resident)
            ],
            out_specs=pl.BlockSpec((tile_n, g), lambda i: (i, 0)),
        ),
        compiler_params=pltpu.CompilerParams(
            dimension_semantics=("parallel",),
            vmem_limit_bytes=vmem_limit,
        ),
    )(coeff_arr, dist_flat, offset2d)

    return out


def make_gaussian_smearing_params(start=0.0, stop=5.0, num_gaussians=50):
    offset = jnp.linspace(start, stop, num_gaussians, dtype=jnp.float32)
    step = (stop - start) / (num_gaussians - 1)
    coeff = -0.5 / (step ** 2)
    return offset, coeff


def reference_gaussian_smearing(dist, offset, coeff):
    d = jnp.reshape(dist, (-1, 1)) - jnp.reshape(offset, (1, -1))
    return jnp.exp(coeff * d * d)


if __name__ == "__main__":
    key = jax.random.PRNGKey(0)
    offset, coeff = make_gaussian_smearing_params(start=0.0, stop=5.0, num_gaussians=50)

    # Small distance tensor, e.g. pairwise distances for a tiny batch: (2, 64) -> N=128 rows.
    dist = jax.random.uniform(key, (2, 64), dtype=jnp.float32, minval=0.0, maxval=5.0)
    out = jax.block_until_ready(gaussian_smearing(dist, offset, coeff))
    ref = reference_gaussian_smearing(dist, offset, coeff)
    assert out.shape == (128, 50), out.shape
    assert out.dtype == jnp.float32
    assert jnp.allclose(out, ref, atol=1e-5, rtol=1e-5), "mismatch vs reference"

    # Misaligned N exercises the partial edge block path (no pad, no slice round-trip).
    dist2 = jax.random.uniform(jax.random.PRNGKey(1), (122,), dtype=jnp.float32,
                               minval=0.0, maxval=5.0)
    out2 = jax.block_until_ready(gaussian_smearing(dist2, offset, coeff, tile_n=64))
    ref2 = reference_gaussian_smearing(dist2, offset, coeff)
    assert out2.shape == (122, 50), out2.shape
    assert jnp.allclose(out2, ref2, atol=1e-5, rtol=1e-5), "mismatch (misaligned N)"

    # bf16 writeback path (recommended when the consumer tolerates it): halves HBM bytes.
    out3 = jax.block_until_ready(
        gaussian_smearing(dist, offset, coeff, out_dtype=jnp.bfloat16))
    assert out3.shape == (128, 50) and out3.dtype == jnp.bfloat16
    assert jnp.allclose(out3.astype(jnp.float32), ref, atol=5e-2), "mismatch (bf16 path)"

    print("KERNEL_OK")
</pallas_src>

<mosaic_0001>
module attributes {stable_mosaic.version = 11 : i64} {
  func.func @_gaussian_smearing_kernel(%arg0: i32, %arg1: memref<1xf32, #tpu.memory_space<smem>>, %arg2: memref<64x1xf32, #tpu.memory_space<vmem>>, %arg3: memref<1x50xf32, #tpu.memory_space<vmem>>, %arg4: memref<64x50xf32, #tpu.memory_space<vmem>>) attributes {dimension_semantics = [#tpu.dimension_semantics<parallel>], iteration_bounds = array<i64: 2>, scalar_prefetch = 0 : i64, scratch_operands = 0 : i64, tpu.core_type = #tpu.core_type<tc>, window_params = [{transform_indices = @transform_0, window_bounds = array<i64: 1>}, {transform_indices = @transform_1, window_bounds = array<i64: 64, 1>}, {pipeline_mode = #tpu.pipeline_mode<synchronous>, transform_indices = @transform_2, window_bounds = array<i64: 1, 50>}, {transform_indices = @transform_3, window_bounds = array<i64: 64, 50>}]} {
    %c0 = arith.constant 0 : index
    %0 = memref.load %arg1[%c0] : memref<1xf32, #tpu.memory_space<smem>>
    %c0_0 = arith.constant 0 : index
    %c0_1 = arith.constant 0 : index
    %1 = vector.load %arg2[%c0_0, %c0_1] : memref<64x1xf32, #tpu.memory_space<vmem>>, vector<64x1xf32>
    %c0_2 = arith.constant 0 : index
    %c0_3 = arith.constant 0 : index
    %2 = vector.load %arg3[%c0_2, %c0_3] : memref<1x50xf32, #tpu.memory_space<vmem>>, vector<1x50xf32>
    %3 = vector.broadcast %1 : vector<64x1xf32> to vector<64x50xf32>
    %4 = vector.broadcast %2 : vector<1x50xf32> to vector<64x50xf32>
    %5 = arith.subf %3, %4 : vector<64x50xf32>
    %6 = vector.broadcast %0 : f32 to vector<64x50xf32>
    %7 = arith.mulf %6, %5 : vector<64x50xf32>
    %8 = arith.mulf %7, %5 : vector<64x50xf32>
    %9 = math.exp %8 : vector<64x50xf32>
    %c0_4 = arith.constant 0 : index
    %c0_5 = arith.constant 0 : index
    %10 = vector.load %arg4[%c0_4, %c0_5] : memref<64x50xf32, #tpu.memory_space<vmem>>, vector<64x50xf32>
    tpu.vector_store %arg4[%c0_4, %c0_5], %9 {strides = array<i32>} : memref<64x50xf32, #tpu.memory_space<vmem>>, vector<64x50xf32>,
    return
  }
  func.func @transform_0(%arg0: i32) -> i32 {
    %c0_i32 = arith.constant 0 : i32
    %c0_i32_0 = arith.constant 0 : i32
    return %c0_i32 : i32
  }
  func.func @transform_1(%arg0: i32) -> (i32, i32) {
    %c0_i32 = arith.constant 0 : i32
    %c0_i32_0 = arith.constant 0 : i32
    return %arg0, %c0_i32 : i32, i32
  }
  func.func @transform_2(%arg0: i32) -> (i32, i32) {
    %c0_i32 = arith.constant 0 : i32
    %c0_i32_0 = arith.constant 0 : i32
    %c0_i32_1 = arith.constant 0 : i32
    return %c0_i32, %c0_i32_0 : i32, i32
  }
  func.func @transform_3(%arg0: i32) -> (i32, i32) {
    %c0_i32 = arith.constant 0 : i32
    %c0_i32_0 = arith.constant 0 : i32
    return %arg0, %c0_i32 : i32, i32
  }
}

</mosaic_0001>

<bundles_post_ra>
// kernel: tpu_custom_call.1
= control target key start
LH: loop header
LB: loop body
LE: loop exit
PB: predicated region body
PF: predicated region fallthrough
CT: control target
= control target key end

     0   :  { %s408_s14 = smov 0   ;;  %s443_s0 = inlined_call_operand.<no memory space> [shape: f32[1], index: 0, kind: input, shape index: {}]   ;;  %s444_s1 = inlined_call_operand.vmem [shape: f32[128,1], index: 1, kind: input, shape index: {}]   ;;  %s445_s2 = inlined_call_operand.vmem [shape: f32[1,50], index: 2, kind: input, shape index: {}]   ;;  %s446_s3 = inlined_call_operand.vmem [shape: f32[128,50], index: 3, kind: output, shape index: {}]  }
   0x1   :  { %8 = sst [smem:[#allocation2]] %s443_s0 }
   0x2 LB: > { %s337_s15 = sadd.s32 4294967295, %s382_s14   ;;  %p341_p0 = scmp.ge.s32.totalorder %s382_s14, 1  ;;  %s382_s14 = sphi %s408_s14, %s14_s14  }
   0x3   : > { %p139_p1 = scmp.lt.s32.totalorder %s382_s14, 3 }
   0x5   : > { %p140_p2 = pnand %p341_p0, %p139_p1 }
   0x6   : > { %s342_s16 = sshll.u32 (!%p140_p2), %s337_s15, 3  ;;  %v384_v0 = vmov (!%p140_p2), 0   ;;  %s175_s20 = sld [smem:[#allocation2]] (!%p140_p2)  ;;  %v346_v9 = vld [vmem:[%s445_s2] ss:$0 sm:$0xff] (!%p140_p2)  ;;  %vm272_vm0 = vcmask (!%p140_p2), 408576  }
   0x7   : > { %143 = sbr.rel (%p140_p2) target bundleno = 179 (0xb3), region = 32  ;;  %359 = vset.pattern.permute.xlu1 (!%p140_p2), %v384_v0  ;;  %358 = vset.pattern.permute.xlu0 (!%p140_p2), %v384_v0  ;;  %p164_p3 = scmp.lt.s32.totalorder (!%p140_p2), %s342_s16, 15 }
   0xc   : > { %v239_v10 = vstv (!%p140_p2), %s175_s20 }
   0xe   : > { %s448_s16 = smov (!%p164_p3, %s342_s16), 15 }
   0xf   : > { %s343_s0 = sshll.u32 %s448_s16, 3 }
  0x10   : > { %s167_s19 = scalar_lea.vmem %s444_s1, %s343_s0  ;;  %s173_s25 = scalar_lea.vmem %s446_s3, %s343_s0 }
  0x11   : > { %v178_v1 = vld [vmem:[%s167_s19 + $0x10] sm:$0xff]  ;;  %v176_v2 = vld [vmem:[%s167_s19] sm:$0xff]  ;;  %v179_v3 = vld [vmem:[%s167_s19 + $0x18] sm:$0xff] }
  0x12   : > { %197 = vperm.xlu1 %359, %v178_v1   ;;  %187 = vperm.xlu0 %358, %v176_v2   ;;  %v177_v4 = vld [vmem:[%s167_s19 + $0x8] sm:$0xff]  ;;  %v180_v6 = vld [vmem:[%s167_s19 + $0x20] sm:$0xff]  ;;  %v183_v7 = vld [vmem:[%s167_s19 + $0x38] sm:$0xff] }
  0x13   : > { %v181_v5 = vld [vmem:[%s167_s19 + $0x28] sm:$0xff]  ;;  %v182_v8 = vld [vmem:[%s167_s19 + $0x30] sm:$0xff] }
  0x16   : > { %202 = vperm.xlu1 %359, %v179_v3   ;;  %192 = vperm.xlu0 %358, %v177_v4  }
  0x1a   : > { %212 = vperm.xlu1 %359, %v181_v5   ;;  %207 = vperm.xlu0 %358, %v180_v6  }
  0x1e   : > { %222 = vperm.xlu1 %359, %v183_v7   ;;  %217 = vperm.xlu0 %358, %v182_v8  }
  0x91   : > { %v198_v11 = vpop.permute.xlu1 %197  ;;  %v188_v12 = vpop.permute.xlu0 %187 }
  0x92   : > { %v233_v13 = vsub.f32 %v198_v11, %v346_v9  ;;  %v231_v14 = vsub.f32 %v188_v12, %v346_v9 }
  0x94   : > { %v242_v15 = vmul.f32 %v239_v10, %v233_v13  ;;  %v240_v16 = vmul.f32 %v239_v10, %v231_v14 }
  0x95   : > { %v203_v17 = vpop.permute.xlu1 %202  ;;  %v193_v18 = vpop.permute.xlu0 %192 }
  0x96   : > { %v250_v19 = vmul.f32 %v242_v15, %v233_v13  ;;  %v248_v20 = vmul.f32 %v240_v16, %v231_v14  ;;  %v234_v21 = vsub.f32 %v203_v17, %v346_v9  ;;  %v232_v22 = vsub.f32 %v193_v18, %v346_v9 }
  0x98   : > { %v260_v23 = vmul.f32 1.442695, %v250_v19  ;;  %v256_v24 = vmul.f32 1.442695, %v248_v20  ;;  %v243_v25 = vmul.f32 %v239_v10, %v234_v21  ;;  %v241_v26 = vmul.f32 %v239_v10, %v232_v22 }
  0x99   : > { %v213_v27 = vpop.permute.xlu1 %212  ;;  %v208_v28 = vpop.permute.xlu0 %207 }
  0x9a   : > { %360 = vpow2.f32 %v260_v23  ;;  %v251_v29 = vmul.f32 %v243_v25, %v234_v21  ;;  %v249_v30 = vmul.f32 %v241_v26, %v232_v22  ;;  %v236_v31 = vsub.f32 %v213_v27, %v346_v9 }
  0x9b   : > { %362 = vpow2.f32 %v256_v24  ;;  %v235_v32 = vsub.f32 %v208_v28, %v346_v9 }
  0x9c   : > { %v262_v33 = vmul.f32 1.442695, %v251_v29  ;;  %v258_v34 = vmul.f32 1.442695, %v249_v30  ;;  %v245_v35 = vmul.f32 %v239_v10, %v236_v31 }
  0x9d   : > { %v244_v36 = vmul.f32 %v239_v10, %v235_v32  ;;  %v223_v37 = vpop.permute.xlu1 %222  ;;  %v218_v38 = vpop.permute.xlu0 %217 }
  0x9e   : > { %364 = vpow2.f32 %v262_v33  ;;  %v253_v39 = vmul.f32 %v245_v35, %v236_v31  ;;  %v238_v40 = vsub.f32 %v223_v37, %v346_v9  ;;  %v237_v41 = vsub.f32 %v218_v38, %v346_v9 }
  0x9f   : > { %366 = vpow2.f32 %v258_v34  ;;  %v252_v42 = vmul.f32 %v244_v36, %v235_v32 }
  0xa0   : > { %v266_v43 = vmul.f32 1.442695, %v253_v39  ;;  %v247_v44 = vmul.f32 %v239_v10, %v238_v40  ;;  %v246_v45 = vmul.f32 %v239_v10, %v237_v41 }
  0xa1   : > { %v264_v46 = vmul.f32 1.442695, %v252_v42 }
  0xa2   : > { %368 = vpow2.f32 %v266_v43  ;;  %v255_v47 = vmul.f32 %v247_v44, %v238_v40  ;;  %v254_v48 = vmul.f32 %v246_v45, %v237_v41 }
  0xa3   : > { %370 = vpow2.f32 %v264_v46 }
  0xa4   : > { %v361_v49 = vpop.eup %360  ;;  %v270_v50 = vmul.f32 1.442695, %v255_v47  ;;  %v268_v51 = vmul.f32 1.442695, %v254_v48 }
  0xa5   : > { %v363_v52 = vpop.eup %362  ;;  %275 = vst.msk [vmem:[%s173_s25 + $0x10] sm:$0xff] %vm272_vm0, %v361_v49 }
  0xa6   : > { %273 = vst.msk [vmem:[%s173_s25] sm:$0xff] %vm272_vm0, %v363_v52  ;;  %372 = vpow2.f32 %v270_v50 }
  0xa7   : > { %374 = vpow2.f32 %v268_v51 }
  0xa8   : > { %v365_v53 = vpop.eup %364 }
  0xa9   : > { %v367_v54 = vpop.eup %366  ;;  %276 = vst.msk [vmem:[%s173_s25 + $0x18] sm:$0xff] %vm272_vm0, %v365_v53 }
  0xaa   : > { %274 = vst.msk [vmem:[%s173_s25 + $0x8] sm:$0xff] %vm272_vm0, %v367_v54 }
  0xac   : > { %v369_v55 = vpop.eup %368 }
  0xad   : > { %v371_v56 = vpop.eup %370  ;;  %278 = vst.msk [vmem:[%s173_s25 + $0x28] sm:$0xff] %vm272_vm0, %v369_v55 }
  0xae   : > { %277 = vst.msk [vmem:[%s173_s25 + $0x20] sm:$0xff] %vm272_vm0, %v371_v56 }
  0xb0   : > { %v373_v57 = vpop.eup %372 }
  0xb1   : > { %v375_v58 = vpop.eup %374  ;;  %280 = vst.msk [vmem:[%s173_s25 + $0x38] sm:$0xff] %vm272_vm0, %v373_v57 }
  0xb2   : > { %279 = vst.msk [vmem:[%s173_s25 + $0x30] sm:$0xff] %vm272_vm0, %v375_v58 }
  0xb3 PF: > { %s14_s14 = sadd.s32 1, %s382_s14  }
  0xb4   : > { %p11_p4 = scmp.ge.s32.totalorder %s14_s14, 4  }
  0xb6   :  { %13 = sbr.rel (!%p11_p4) target bundleno = 2 (0x2), region = 62 }

</bundles_post_ra>
